<compile_context>
chip_gen: v7x
topology: tpu7x:2x2x1
jax: 0.10.0
libtpu: 0.0.40
codegen_flags: <defaults>
</compile_context>

<pallas_src>
import math

import jax
import jax.numpy as jnp
from jax.experimental import pallas as pl
from jax.experimental.pallas import tpu as pltpu

_LANE = 128
_COL_TARGET = 2048                  # preferred lane-dense block width (multiple of 128)
_VMEM_BUDGET = 24 * 1024 * 1024     # per-step working set: in+out, double buffered (4 bufs)
_VMEM_LIMIT = 48 << 20              # raised scoped-VMEM limit (safe on v5e/v6e/v7x)


def _relu_kernel(m_ref, o_ref):
    x = m_ref[...]
    o_ref[...] = jnp.maximum(x, jnp.zeros_like(x))


def _sublane_pack(itemsize):
    # Sublane packing: 8 rows for 32-bit, 16 for 16-bit, 32 for 8-bit dtypes.
    return max(8, 32 // max(1, itemsize))


def _pick_cols(total):
    """Largest multiple of 128 that divides `total`, capped at _COL_TARGET."""
    best = None
    c = _LANE
    while c <= min(_COL_TARGET, total):
        if total % c == 0:
            best = c
        c += _LANE
    return best


def _pick_col_tile(cols, itemsize, pack):
    """Full-width column block when it comfortably fits the budget, else a
    lane-aligned tile (ragged last block handled by Pallas)."""
    if 4 * pack * cols * itemsize <= _VMEM_BUDGET or cols < _LANE:
        return cols
    tc = (_VMEM_BUDGET // (4 * pack * itemsize) // _LANE) * _LANE
    return max(_LANE, min(_COL_TARGET, tc))


def _pick_row_tile(rows, tc, itemsize, pack):
    """Row tile under the VMEM budget, multiple of `pack` (or full rows).

    * Guarantees >= 2 grid steps when rows >= 2*pack so both v7x TensorCores
      get work on the "parallel" axis.
    * Prefers a pack-aligned tile that evenly divides `rows` (no ragged last
      block / masked stores) as long as it stays within 2x of the budget tile.
    """
    budget_rows = _VMEM_BUDGET // (4 * tc * itemsize)
    budget_rows = max(pack, (budget_rows // pack) * pack)

    if rows <= budget_rows:
        if rows >= 2 * pack:
            half = ((rows + 1) // 2 + pack - 1) // pack * pack
            return min(half, rows)
        return rows

    tr = budget_rows
    while tr >= max(pack, budget_rows // 2):
        if rows % tr == 0:
            return tr
        tr -= pack
    return budget_rows


def complex_relu(m, phi):
    """Pallas implementation of ComplexReLU.forward: returns (relu(m), phi)."""
    orig_shape = m.shape
    dtype = m.dtype
    total = int(math.prod(orig_shape)) if orig_shape else 1
    itemsize = jnp.dtype(dtype).itemsize
    pack = _sublane_pack(itemsize)

    # Degenerate cases (scalar / empty): no kernel needed.
    if m.ndim == 0 or total == 0:
        return jnp.maximum(m, jnp.zeros((), dtype=dtype)), phi

    cols = _pick_cols(total)
    if cols is not None:
        # Lane-dense 2-D view (contiguous row-major collapse of all dims).
        rows = total // cols
    else:
        # Total not divisible by 128: keep the original trailing dim as the
        # lane axis and collapse only the leading dims — no pad pass and no
        # slice pass, a single HBM read + write like the main path.
        # TODO(synk): last dims that are not multiples of 128 use masked
        # partial stores on the lane axis (still only one HBM pass).
        cols = orig_shape[-1]
        rows = total // cols
    view = m.reshape(rows, cols)

    tc = _pick_col_tile(cols, itemsize, pack)
    tr = _pick_row_tile(rows, tc, itemsize, pack)
    grid = (pl.cdiv(rows, tr), pl.cdiv(cols, tc))

    out2d = pl.pallas_call(
        _relu_kernel,
        out_shape=jax.ShapeDtypeStruct((rows, cols), dtype),
        grid_spec=pltpu.PrefetchScalarGridSpec(
            num_scalar_prefetch=0,
            grid=grid,
            in_specs=[pl.BlockSpec((tr, tc), lambda i, j: (i, j))],
            out_specs=pl.BlockSpec((tr, tc), lambda i, j: (i, j)),
        ),
        compiler_params=pltpu.CompilerParams(
            dimension_semantics=("parallel", "parallel"),
            vmem_limit_bytes=_VMEM_LIMIT,
        ),
        cost_estimate=pl.CostEstimate(
            flops=total,
            transcendentals=0,
            bytes_accessed=2 * total * itemsize,
        ),
    )(view)

    # phi is returned unmodified (identity), exactly like the PyTorch module.
    return out2d.reshape(orig_shape), phi


if __name__ == "__main__":
    key = jax.random.PRNGKey(0)
    km, kp, km2, kp2 = jax.random.split(key, 4)

    # Main (lane-friendly) shape: N, C, H, W = 2, 4, 16, 16.
    N, C, H, W = 2, 4, 16, 16
    m = jax.random.normal(km, (N, C, H, W), dtype=jnp.float32)
    phi = jax.random.uniform(kp, (N, C, H, W), dtype=jnp.float32,
                             minval=-math.pi, maxval=math.pi)
    m_out, phi_out = complex_relu(m, phi)
    m_out = jax.block_until_ready(m_out)
    phi_out = jax.block_until_ready(phi_out)
    assert m_out.shape == m.shape and m_out.dtype == m.dtype
    assert jnp.allclose(m_out, jnp.maximum(m, 0.0), rtol=0, atol=0)
    assert phi_out.shape == phi.shape and phi_out.dtype == phi.dtype
    assert jnp.array_equal(phi_out, phi)

    # Non-128-divisible shape: exercises the pad-free fallback path.
    m2 = jax.random.normal(km2, (2, 3, 5, 7), dtype=jnp.float32)
    phi2 = jax.random.uniform(kp2, (2, 3, 5, 7), dtype=jnp.float32,
                              minval=-math.pi, maxval=math.pi)
    m2_out, phi2_out = complex_relu(m2, phi2)
    m2_out = jax.block_until_ready(m2_out)
    phi2_out = jax.block_until_ready(phi2_out)
    assert jnp.allclose(m2_out, jnp.maximum(m2, 0.0), rtol=0, atol=0)
    assert jnp.array_equal(phi2_out, phi2)

    print("KERNEL_OK")
</pallas_src>

<mosaic_0001>
module attributes {stable_mosaic.version = 11 : i64} {
  func.func @_relu_kernel(%arg0: i32, %arg1: i32, %arg2: memref<1x2048xf32, #tpu.memory_space<vmem>>, %arg3: memref<1x2048xf32, #tpu.memory_space<vmem>>) attributes {dimension_semantics = [#tpu.dimension_semantics<parallel>, #tpu.dimension_semantics<parallel>], iteration_bounds = array<i64: 1, 1>, scalar_prefetch = 0 : i64, scratch_operands = 0 : i64, tpu.core_type = #tpu.core_type<tc>, window_params = [{transform_indices = @transform_0, window_bounds = array<i64: 1, 2048>}, {transform_indices = @transform_1, window_bounds = array<i64: 1, 2048>}]} {
    %c0 = arith.constant 0 : index
    %c0_0 = arith.constant 0 : index
    %0 = vector.load %arg2[%c0, %c0_0] : memref<1x2048xf32, #tpu.memory_space<vmem>>, vector<1x2048xf32>
    %cst = arith.constant 0.000000e+00 : f32
    %1 = vector.broadcast %cst : f32 to vector<1x2048xf32>
    %2 = arith.maximumf %0, %1 : vector<1x2048xf32>
    %c0_1 = arith.constant 0 : index
    %c0_2 = arith.constant 0 : index
    %3 = vector.load %arg3[%c0_1, %c0_2] : memref<1x2048xf32, #tpu.memory_space<vmem>>, vector<1x2048xf32>
    tpu.vector_store %arg3[%c0_1, %c0_2], %2 {strides = array<i32>} : memref<1x2048xf32, #tpu.memory_space<vmem>>, vector<1x2048xf32>,
    return
  }
  func.func @transform_0(%arg0: i32, %arg1: i32) -> (i32, i32) {
    %c0_i32 = arith.constant 0 : i32
    return %arg0, %arg1 : i32, i32
  }
  func.func @transform_1(%arg0: i32, %arg1: i32) -> (i32, i32) {
    %c0_i32 = arith.constant 0 : i32
    return %arg0, %arg1 : i32, i32
  }
}

</mosaic_0001>

<bundles_post_ra>
// kernel: tpu_custom_call.1
= control target key start
LH: loop header
LB: loop body
LE: loop exit
PB: predicated region body
PF: predicated region fallthrough
CT: control target
= control target key end

     0   :  { %6 = vsyncpa [#allocation3], 0  ;;  %s128_s0 = inlined_call_operand.hbm [shape: f32[1,2048], index: 0, kind: input, shape index: {}]   ;;  %s129_s1 = inlined_call_operand.hbm [shape: f32[1,2048], index: 1, kind: output, shape index: {}]  }
   0x1   :  { %7 = vsyncpa [#allocation4], 0  ;;  %s92_s6 = smov [#allocation2]   ;;  %s44_s10 = scalar_lea.hbm %s128_s0, 256 }
   0x2   :  { %s14_s7 = sshll.u32 %s92_s6, 4  ;;  %p45_p0 = scmp.ne.s32.totalorder %s128_s0, %s44_s10  ;;  %s15_s7 = int_to_ptr.vmem [resolvable:$true] %s14_s7 }
   0x3   :  { %p48_p1 = scmp.lt.u32.totalorder %s44_s10, %s128_s0 }
   0x5   :  { %p50_p2 = pnand %p48_p1, %p45_p0 }
   0x7   :  { %53 = shalt.err (!%p50_p2)
}
   0x8   :  { %s54_s15 = scalar_lea.vmem %s15_s7, 256  ;;  %p59_p4 = scmp.lt.s32.totalorder %s15_s7, %s15_s7 }
   0x9   :  { %p55_p3 = scmp.ne.s32.totalorder %s15_s7, %s54_s15  ;;  %p60_p5 = scmp.lt.s32.totalorder %s54_s15, %s54_s15 }
   0xb   :  { %p61_p6 = por %p60_p5, %p59_p4 }
   0xd   :  { %p62_p7 = pnand %p61_p6, %p55_p3 }
   0xf   :  { %65 = shalt.err (!%p62_p7)
}
  0x10   :  { %17 = dma.hbm_to_vmem [thread:$0]  %s128_s0, 256, %s15_s7, [#allocation3]  }
  0x11   :  { %88 = dma.done.wait [#allocation3], 256  }
  0x12   :  { %89 = vsyncadd [#allocation3], 4294967040  ;;  %s93_s18 = smov [#allocation5]   ;;  %v21_v0 = vld [vmem:[#allocation2] sm:$0xff]  ;;  %v22_v1 = vld [vmem:[#allocation2 + $0x8] sm:$0xff] }
  0x13   :  { %s33_s19 = sshll.u32 %s93_s18, 4  ;;  %v23_v2 = vmax.f32 %v21_v0, 0.0  ;;  %v24_v3 = vmax.f32 %v22_v1, 0.0  ;;  %s34_s19 = int_to_ptr.vmem [resolvable:$true] %s33_s19 }
  0x14   :  { %s66_s20 = scalar_lea.vmem %s34_s19, 256  ;;  %p71_p9 = scmp.lt.s32.totalorder %s34_s19, %s34_s19 }
  0x15   :  { %25 = vst [vmem:[#allocation5] sm:$0xff] %v23_v2  ;;  %26 = vst [vmem:[#allocation5 + $0x8] sm:$0xff] %v24_v3  ;;  %p67_p8 = scmp.ne.s32.totalorder %s34_s19, %s66_s20  ;;  %p72_p10 = scmp.lt.s32.totalorder %s66_s20, %s66_s20 }
  0x17   :  { %p73_p11 = por %p72_p10, %p71_p9 }
  0x19   :  { %p74_p12 = pnand %p73_p11, %p67_p8 }
  0x1b   :  { %77 = shalt.err (!%p74_p12)
}
  0x1c   :  { %s78_s22 = scalar_lea.hbm %s129_s1, 256 }
  0x1d   :  { %p79_p13 = scmp.ne.s32.totalorder %s129_s1, %s78_s22  ;;  %p82_p0 = scmp.lt.u32.totalorder %s78_s22, %s129_s1 }
  0x1f   :  { %p84_p1 = pnand %p82_p0, %p79_p13 }
  0x21   :  { %87 = shalt.err (!%p84_p1)
}
  0x22   :  { %36 = dma.vmem_to_hbm [thread:$0]  %s34_s19, 256, %s129_s1, [#allocation4]  }
  0x23   :  { %90 = dma.done.wait [#allocation4], 256  }
  0x24   :  { %91 = vsyncadd [#allocation4], 4294967040 }
  0x25   :  { %40 = vsyncpa [#allocation3], 1 }
  0x26   :  { %41 = vsyncpa [#allocation4], 1 }

</bundles_post_ra>
